<compile_context>
chip_gen: v6e
topology: v6e:2x2x1
jax: 0.10.0
libtpu: 0.0.40
codegen_flags: <defaults>
</compile_context>

<pallas_src>
import jax
import jax.numpy as jnp
from jax.experimental import pallas as pl
from jax.experimental.pallas import tpu as pltpu


def _gap_full_hw_kernel(inv_hw: float):
    """Fast path: the whole spatial extent is one block -> single-pass mean."""

    def kernel(x_ref, o_ref):
        x = x_ref[...].astype(jnp.float32)
        o_ref[...] = (jnp.sum(x, axis=-1, keepdims=True) * inv_hw).astype(o_ref.dtype)

    return kernel


def _gap_blocked_kernel(hw: int, tile_hw: int):
    """Fallback path: hw split across grid axis 1 (reduction axis, last in grid)."""
    needs_mask = (hw % tile_hw) != 0
    inv_hw = 1.0 / float(hw)

    def kernel(x_ref, o_ref, acc_ref):
        # x_ref:  (tile_rows, tile_hw) input block
        # o_ref:  (tile_rows, 1) output block (resident across the hw axis)
        # acc_ref:(tile_rows, 1) f32 VMEM accumulator
        k = pl.program_id(1)
        last = pl.num_programs(1) - 1

        @pl.when(k == 0)
        def _():
            acc_ref[...] = jnp.zeros_like(acc_ref)

        if needs_mask:
            # Plain VPU-add + one XLU reduce on all full blocks ...
            @pl.when(k < last)
            def _():
                acc_ref[...] += jnp.sum(
                    x_ref[...].astype(jnp.float32), axis=-1, keepdims=True)

            # ... mask (iota/cmp/select) only on the ragged last block.
            @pl.when(k == last)
            def _():
                x = x_ref[...].astype(jnp.float32)
                col = jax.lax.broadcasted_iota(jnp.int32, x.shape, 1)
                x = jnp.where(k * tile_hw + col < hw, x, 0.0)
                acc_ref[...] += jnp.sum(x, axis=-1, keepdims=True)
        else:
            acc_ref[...] += jnp.sum(
                x_ref[...].astype(jnp.float32), axis=-1, keepdims=True)

        @pl.when(k == last)
        def _():
            o_ref[...] = (acc_ref[...] * inv_hw).astype(o_ref.dtype)

    return kernel


def global_avg_pool2d(x: jax.Array, *, tile_rows=None, tile_hw=None) -> jax.Array:
    """Equivalent of F.avg_pool2d(x, kernel_size=x.shape[2:]) for NCHW input."""
    n, c, h, w = x.shape
    rows = n * c
    hw = h * w
    x2d = x.reshape(rows, hw)

    lane = 128
    itemsize = jnp.dtype(x.dtype).itemsize
    # Sublane pack factor: 8 rows (f32), 16 (bf16/f16), 32 (int8/fp8).
    pack = 8 * max(1, 4 // itemsize)

    # --- generation-specific block-byte budget (v7x: bigger blocks, 2 TCs). ---
    kind = ""
    try:
        kind = jax.devices()[0].device_kind.lower()
    except Exception:  # pragma: no cover - defensive, keeps wrapper usable anywhere
        pass
    is_v7 = "v7" in kind
    target_block_bytes = (8 if is_v7 else 4) * 1024 * 1024
    row_cap = 256  # keep the (tile_rows, 1) reduce result <= 32 vregs

    # --- hw (lane / reduction) tile: prefer the FULL spatial extent. -----------
    hw_lane_padded = pl.cdiv(hw, lane) * lane
    if tile_hw is None:
        # Keep full-hw whenever even a minimal pack-row tile fits the block budget.
        if pack * hw_lane_padded * itemsize <= target_block_bytes:
            tile_hw = hw
        else:
            # Even-ish, lane-aligned blocks: round_up(cdiv(hw, n_blocks), 128).
            max_tile = max(lane,
                           (target_block_bytes // (pack * itemsize) // lane) * lane)
            n_blocks = pl.cdiv(hw, max_tile)
            tile_hw = min(pl.cdiv(pl.cdiv(hw, n_blocks), lane) * lane, hw)
    else:
        # Sanitize explicit overrides: lane-align or use full hw.
        tile_hw = int(tile_hw)
        if tile_hw >= hw:
            tile_hw = hw
        else:
            tile_hw = min(pl.cdiv(tile_hw, lane) * lane, hw)

    full_hw = tile_hw == hw
    tile_hw_padded = pl.cdiv(tile_hw, lane) * lane

    # --- row tile: fill the block budget, cap for vreg pressure, pack-align. ---
    if tile_rows is None:
        tile_rows = target_block_bytes // max(1, tile_hw_padded * itemsize)
        tile_rows = min(tile_rows, row_cap)
    tile_rows = max(pack, (int(tile_rows) // pack) * pack)
    tile_rows = min(tile_rows, pl.cdiv(rows, pack) * pack)

    # v7x has 2 TensorCores sharded over the "parallel" axis: make sure it is >= 2
    # wide whenever the data allows, otherwise one core sits idle.
    if is_v7 and pl.cdiv(rows, tile_rows) == 1 and rows > pack:
        tile_rows = max(pack, ((tile_rows // 2) // pack) * pack)

    in_block_bytes = tile_rows * tile_hw_padded * itemsize
    vmem_limit = int(min(max(2 * in_block_bytes + 4 * 1024 * 1024,
                             16 * 1024 * 1024),
                         64 * 1024 * 1024))

    cost = pl.CostEstimate(
        flops=rows * hw + rows,
        transcendentals=0,
        bytes_accessed=rows * hw * itemsize + rows * itemsize,
    )

    if full_hw:
        # 1-D, all-parallel grid: contiguous DMAs, no mask, no scratch.
        grid = (pl.cdiv(rows, tile_rows),)
        kernel = _gap_full_hw_kernel(1.0 / float(hw))
        in_specs = [pl.BlockSpec((tile_rows, hw), lambda i: (i, 0))]
        out_specs = pl.BlockSpec((tile_rows, 1), lambda i: (i, 0))
        scratch_shapes = []
        dims = ("parallel",)
    else:
        # 2-D grid, reduction (hw) axis last.
        grid = (pl.cdiv(rows, tile_rows), pl.cdiv(hw, tile_hw))
        kernel = _gap_blocked_kernel(hw, tile_hw)
        in_specs = [pl.BlockSpec((tile_rows, tile_hw), lambda i, k: (i, k))]
        out_specs = pl.BlockSpec((tile_rows, 1), lambda i, k: (i, 0))
        scratch_shapes = [pltpu.VMEM((tile_rows, 1), jnp.float32)]
        dims = ("parallel", "arbitrary")

    out2d = pl.pallas_call(
        kernel,
        out_shape=jax.ShapeDtypeStruct((rows, 1), x.dtype),
        grid_spec=pltpu.PrefetchScalarGridSpec(
            num_scalar_prefetch=0,
            grid=grid,
            in_specs=in_specs,
            out_specs=out_specs,
            scratch_shapes=scratch_shapes,
        ),
        compiler_params=pltpu.CompilerParams(
            dimension_semantics=dims,
            vmem_limit_bytes=vmem_limit,
        ),
        cost_estimate=cost,
    )(x2d)

    return out2d.reshape(n, c, 1, 1)


if __name__ == "__main__":
    key = jax.random.PRNGKey(0)

    # Primary case (matches the module's typical small NCHW input): full-hw fast path.
    N, C, H, W = 2, 4, 16, 16
    x = jax.random.normal(key, (N, C, H, W), dtype=jnp.float32)
    out = jax.block_until_ready(global_avg_pool2d(x))
    ref = jnp.mean(x, axis=(2, 3), keepdims=True)
    assert out.shape == (N, C, 1, 1), out.shape
    assert jnp.allclose(out, ref, atol=1e-5, rtol=1e-5)

    # Ragged row tile on the fast path (rows not a multiple of the row tile).
    x2 = jax.random.normal(jax.random.PRNGKey(1), (3, 5, 20, 20), dtype=jnp.float32)
    out2 = jax.block_until_ready(global_avg_pool2d(x2))
    ref2 = jnp.mean(x2, axis=(2, 3), keepdims=True)
    assert jnp.allclose(out2, ref2, atol=1e-5, rtol=1e-5)

    # Multiple row blocks on the fast path (rows=260 > row tile), ragged last block.
    x3 = jax.random.normal(jax.random.PRNGKey(2), (2, 130, 14, 14), dtype=jnp.float32)
    out3 = jax.block_until_ready(global_avg_pool2d(x3))
    ref3 = jnp.mean(x3, axis=(2, 3), keepdims=True)
    assert jnp.allclose(out3, ref3, atol=1e-5, rtol=1e-5)

    # Force the hw-blocked fallback path (explicit non-aligned tile_hw override is
    # sanitized to a 128-multiple; last hw block is ragged -> masked only there).
    x4 = jax.random.normal(jax.random.PRNGKey(3), (1, 2, 50, 50), dtype=jnp.float32)
    out4 = jax.block_until_ready(global_avg_pool2d(x4, tile_hw=500))
    ref4 = jnp.mean(x4, axis=(2, 3), keepdims=True)
    assert jnp.allclose(out4, ref4, atol=1e-5, rtol=1e-5)

    print("KERNEL_OK")
</pallas_src>

<mosaic_0001>
module attributes {stable_mosaic.version = 11 : i64} {
  func.func @kernel(%arg0: i32, %arg1: memref<8x256xf32, #tpu.memory_space<vmem>>, %arg2: memref<8x1xf32, #tpu.memory_space<vmem>>) attributes {dimension_semantics = [#tpu.dimension_semantics<parallel>], iteration_bounds = array<i64: 1>, scalar_prefetch = 0 : i64, scratch_operands = 0 : i64, tpu.core_type = #tpu.core_type<tc>, window_params = [{transform_indices = @transform_0, window_bounds = array<i64: 8, 256>}, {transform_indices = @transform_1, window_bounds = array<i64: 8, 1>}]} {
    %c0 = arith.constant 0 : index
    %c0_0 = arith.constant 0 : index
    %0 = vector.load %arg1[%c0, %c0_0] : memref<8x256xf32, #tpu.memory_space<vmem>>, vector<8x256xf32>
    %cst = arith.constant dense<0.000000e+00> : vector<8xf32>
    %1 = vector.multi_reduction <add>, %0, %cst [1] : vector<8x256xf32> to vector<8xf32>
    %2 = vector.shape_cast %1 : vector<8xf32> to vector<8x1xf32>
    %cst_1 = arith.constant 3.906250e-03 : f32
    %3 = vector.broadcast %cst_1 : f32 to vector<8x1xf32>
    %4 = arith.mulf %2, %3 : vector<8x1xf32>
    %c0_2 = arith.constant 0 : index
    %c0_3 = arith.constant 0 : index
    %5 = vector.load %arg2[%c0_2, %c0_3] : memref<8x1xf32, #tpu.memory_space<vmem>>, vector<8x1xf32>
    tpu.vector_store %arg2[%c0_2, %c0_3], %4 {strides = array<i32>} : memref<8x1xf32, #tpu.memory_space<vmem>>, vector<8x1xf32>,
    return
  }
  func.func @transform_0(%arg0: i32) -> (i32, i32) {
    %c0_i32 = arith.constant 0 : i32
    %c0_i32_0 = arith.constant 0 : i32
    return %arg0, %c0_i32 : i32, i32
  }
  func.func @transform_1(%arg0: i32) -> (i32, i32) {
    %c0_i32 = arith.constant 0 : i32
    %c0_i32_0 = arith.constant 0 : i32
    return %arg0, %c0_i32 : i32, i32
  }
}

</mosaic_0001>

<bundles_post_ra>
// kernel: tpu_custom_call.1
= control target key start
LH: loop header
LB: loop body
LE: loop exit
PB: predicated region body
PF: predicated region fallthrough
CT: control target
= control target key end

     0   :  { %6 = vsyncpa [#allocation3], 0  ;;  %s56_s6 = smov [#allocation2]   ;;  %s73_s0 = inlined_call_operand.hbm [shape: f32[8,256], index: 0, kind: input, shape index: {}]   ;;  %s74_s1 = inlined_call_operand.vmem [shape: f32[8,1], index: 1, kind: output, shape index: {}]  }
   0x1   :  { %s13_s7 = sshll.u32 %s56_s6, 4  ;;  %s14_s7 = int_to_ptr.vmem [resolvable:$true] %s13_s7 }
   0x2   :  { %s42_s8 = scalar_lea.vmem %s14_s7, 256  ;;  %p47_p1 = scmp.lt.s32.totalorder %s14_s7, %s14_s7 }
   0x3   :  { %p43_p0 = scmp.ne.s32.totalorder %s14_s7, %s42_s8  ;;  %p48_p2 = scmp.lt.s32.totalorder %s42_s8, %s42_s8 }
   0x5   :  { %p49_p3 = por %p48_p2, %p47_p1 }
   0x7   :  { %p50_p4 = pnand %p49_p3, %p43_p0 }
   0x9   :  { %53 = shalt.err (!%p50_p4)
}
   0xa   :  { %16 = dma.hbm_to_vmem [thread:$0]  %s73_s0, 256, %s14_s7, [#allocation3]  }
   0xb   :  { %54 = dma.done.wait [#allocation3], 256  }
   0xc   :  { %55 = vsyncadd [#allocation3], 4294967040  ;;  %v20_v0 = vld [vmem:[#allocation2] sm:$0xff]  ;;  %v21_v1 = vld [vmem:[#allocation2 + $0x8] sm:$0xff]  ;;  %vm26_vm0 = vcmask 7168  }
   0xd   :  { %v22_v2 = vadd.f32 %v21_v1, %v20_v0 }
   0xf   :  { %23 = vadd.xlane.f32.xlu0 %v22_v2 }
  0x98   :  { %v24_v3 = vpop.xlane.xlu0 %23 }
  0x99   :  { %v25_v4 = vmul.f32 0.00390625, %v24_v3 }
  0x9b   :  { %27 = vst.msk [vmem:[%s74_s1] sm:$0xff] %vm26_vm0, %v25_v4 }
  0x9c   :  { %32 = vsyncpa [#allocation3], 1 }

</bundles_post_ra>
